<compile_context>
chip_gen: v7x
topology: tpu7x:2x2x1
jax: 0.10.0
libtpu: 0.0.40
codegen_flags: <defaults>
</compile_context>

<pallas_src>
import functools

import jax
import jax.numpy as jnp
from jax.experimental import pallas as pl
from jax.experimental.pallas import tpu as pltpu

BN_EPS = 1e-5
LANES = 128


def _round_up(x, m):
    return (x + m - 1) // m * m


# ---------- Pass 1: conv (matmul + bias) + global per-channel sum / sum-of-squares ----------
def _conv_stats_kernel(patches_ref, w_ref, b_ref, y_ref, sum_ref, sumsq_ref, *,
                       tile_m, m_valid):
    i = pl.program_id(0)

    # Conv1d as MXU matmul: bf16 operands, f32 accumulate, then f32 bias.
    y = jnp.dot(patches_ref[...], w_ref[...], preferred_element_type=jnp.float32)
    y = y + b_ref[...]
    y_ref[...] = y

    # Rows beyond the true M (M-padding) must not pollute the batch statistics.
    row = i * tile_m + jax.lax.broadcasted_iota(jnp.int32, (tile_m, 1), 0)
    ym = jnp.where(row < m_valid, y, 0.0)

    s = jnp.sum(ym, axis=0, keepdims=True)         # (1, Cp)
    sq = jnp.sum(ym * ym, axis=0, keepdims=True)   # (1, Cp)

    @pl.when(i == 0)
    def _():
        sum_ref[...] = jnp.zeros_like(sum_ref)
        sumsq_ref[...] = jnp.zeros_like(sumsq_ref)

    sum_ref[...] += s
    sumsq_ref[...] += sq


# ---------- Pass 2: BatchNorm1d (train-mode, biased batch stats) + ReLU ----------
def _bn_relu_kernel(y_ref, sum_ref, sumsq_ref, gamma_ref, beta_ref, o_ref, *, inv_m):
    mean = sum_ref[...] * inv_m
    var = jnp.maximum(sumsq_ref[...] * inv_m - mean * mean, 0.0)
    scale = gamma_ref[...] * jax.lax.rsqrt(var + BN_EPS)      # EUP rsqrt
    shift = beta_ref[...] - mean * scale
    o_ref[...] = jnp.maximum(y_ref[...] * scale + shift, 0.0).astype(o_ref.dtype)


def conv_block_forward(x, weight, bias, gamma, beta, *, stride, pad, tile_m=512):
    """x: (N, C_in, L) f32.  weight: (C_out, C_in, K).  Returns (N, C_out, L_out) f32."""
    N, C_in, L = x.shape
    C_out, _, K = weight.shape
    L_out = (L + 2 * pad - K) // stride + 1
    M = N * L_out
    CK = C_in * K
    Cp = _round_up(C_out, LANES)                     # lane-dense output channels

    # ---- glue (plain JAX): zero-pad + im2col, bf16 MXU operands ----
    x_pad = jnp.pad(x, ((0, 0), (0, 0), (pad, pad)))
    cols = [x_pad[:, :, k: k + stride * L_out: stride] for k in range(K)]   # each (N, C_in, L_out)
    patches = jnp.stack(cols, axis=-1)               # (N, C_in, L_out, K)
    patches = jnp.transpose(patches, (0, 2, 1, 3))   # (N, L_out, C_in, K)
    patches = patches.reshape(M, CK)

    tm = min(tile_m, _round_up(M, 16))               # 16: bf16 sublane packing
    M_pad = _round_up(M, tm)
    num_tiles = M_pad // tm

    patches = jnp.pad(patches, ((0, M_pad - M), (0, 0))).astype(jnp.bfloat16)
    w_mat = jnp.pad(weight.reshape(C_out, CK).T,
                    ((0, 0), (0, Cp - C_out))).astype(jnp.bfloat16)          # (CK, Cp)
    b_row = jnp.pad(bias.reshape(1, C_out), ((0, 0), (0, Cp - C_out))).astype(jnp.float32)
    g_row = jnp.pad(gamma.reshape(1, C_out), ((0, 0), (0, Cp - C_out))).astype(jnp.float32)
    be_row = jnp.pad(beta.reshape(1, C_out), ((0, 0), (0, Cp - C_out))).astype(jnp.float32)

    # ---- pass 1: conv + batch-stat accumulation (sequential over M tiles) ----
    conv_cost = pl.CostEstimate(
        flops=2 * M_pad * CK * Cp + 4 * M_pad * Cp,
        transcendentals=0,
        bytes_accessed=M_pad * CK * 2 + CK * Cp * 2 + M_pad * Cp * 4 + 3 * Cp * 4,
    )
    y_conv, ch_sum, ch_sumsq = pl.pallas_call(
        functools.partial(_conv_stats_kernel, tile_m=tm, m_valid=M),
        out_shape=(
            jax.ShapeDtypeStruct((M_pad, Cp), jnp.float32),
            jax.ShapeDtypeStruct((1, Cp), jnp.float32),
            jax.ShapeDtypeStruct((1, Cp), jnp.float32),
        ),
        grid=(num_tiles,),
        in_specs=[
            pl.BlockSpec((tm, CK), lambda i: (i, 0)),
            pl.BlockSpec((CK, Cp), lambda i: (0, 0)),
            pl.BlockSpec((1, Cp), lambda i: (0, 0)),
        ],
        out_specs=(
            pl.BlockSpec((tm, Cp), lambda i: (i, 0)),
            pl.BlockSpec((1, Cp), lambda i: (0, 0)),   # resident accumulator
            pl.BlockSpec((1, Cp), lambda i: (0, 0)),   # resident accumulator
        ),
        compiler_params=pltpu.CompilerParams(dimension_semantics=("arbitrary",)),
        cost_estimate=conv_cost,
    )(patches, w_mat, b_row)

    # ---- pass 2: normalize + ReLU (independent per tile -> parallel / megacore) ----
    bn_cost = pl.CostEstimate(
        flops=6 * M_pad * Cp,
        transcendentals=Cp,
        bytes_accessed=2 * M_pad * Cp * 4 + 4 * Cp * 4,
    )
    out = pl.pallas_call(
        functools.partial(_bn_relu_kernel, inv_m=1.0 / M),
        out_shape=jax.ShapeDtypeStruct((M_pad, Cp), jnp.float32),
        grid=(num_tiles,),
        in_specs=[
            pl.BlockSpec((tm, Cp), lambda i: (i, 0)),
            pl.BlockSpec((1, Cp), lambda i: (0, 0)),
            pl.BlockSpec((1, Cp), lambda i: (0, 0)),
            pl.BlockSpec((1, Cp), lambda i: (0, 0)),
            pl.BlockSpec((1, Cp), lambda i: (0, 0)),
        ],
        out_specs=pl.BlockSpec((tm, Cp), lambda i: (i, 0)),
        compiler_params=pltpu.CompilerParams(dimension_semantics=("parallel",)),
        cost_estimate=bn_cost,
    )(y_conv, ch_sum, ch_sumsq, g_row, be_row)

    # slice off channel / row padding, back to PyTorch NCL layout
    out = out[:M, :C_out].reshape(N, L_out, C_out)
    return jnp.transpose(out, (0, 2, 1))


if __name__ == "__main__":
    # ConvBlock(in_channel=4, out_channel=8, kernel_size=3, stride=1, pad=1,
    #           batch_norm=True, bias=True)
    N, C_in, L = 2, 4, 16
    C_out, K, stride, pad = 8, 3, 1, 1
    L_out = (L + 2 * pad - K) // stride + 1

    key = jax.random.PRNGKey(0)
    kx, kw, kb = jax.random.split(key, 3)

    x = jax.random.normal(kx, (N, C_in, L), dtype=jnp.float32)

    # PyTorch Conv1d default init: U(-bound, bound), bound = 1/sqrt(C_in*K)
    bound = 1.0 / jnp.sqrt(float(C_in * K))
    weight = jax.random.uniform(kw, (C_out, C_in, K), minval=-bound, maxval=bound,
                                dtype=jnp.float32)
    bias = jax.random.uniform(kb, (C_out,), minval=-bound, maxval=bound, dtype=jnp.float32)
    gamma = jnp.ones((C_out,), dtype=jnp.float32)   # BatchNorm1d weight init
    beta = jnp.zeros((C_out,), dtype=jnp.float32)   # BatchNorm1d bias init

    y = conv_block_forward(x, weight, bias, gamma, beta, stride=stride, pad=pad)
    jax.block_until_ready(y)
    assert y.shape == (N, C_out, L_out), f"unexpected output shape {y.shape}"

    # pure-JAX f32 reference (Conv1d -> train-mode BatchNorm1d -> ReLU)
    xp = jnp.pad(x, ((0, 0), (0, 0), (pad, pad)))
    ref_cols = jnp.stack([xp[:, :, k: k + stride * L_out: stride] for k in range(K)], axis=-1)
    ref_conv = jnp.einsum("nclk,ock->nol", ref_cols, weight) + bias[None, :, None]
    mu = jnp.mean(ref_conv, axis=(0, 2), keepdims=True)
    var = jnp.mean((ref_conv - mu) ** 2, axis=(0, 2), keepdims=True)
    ref = jnp.maximum((ref_conv - mu) * jax.lax.rsqrt(var + BN_EPS)
                      * gamma[None, :, None] + beta[None, :, None], 0.0)
    assert jnp.allclose(y, ref, atol=5e-2, rtol=5e-2), "mismatch vs f32 reference"

    print("KERNEL_OK")
</pallas_src>

<mosaic_0001>
module attributes {stable_mosaic.version = 11 : i64} {
  func.func @_conv_stats_kernel(%arg0: i32, %arg1: memref<32x12xbf16, #tpu.memory_space<vmem>>, %arg2: memref<12x128xbf16, #tpu.memory_space<vmem>>, %arg3: memref<1x128xf32, #tpu.memory_space<vmem>>, %arg4: memref<32x128xf32, #tpu.memory_space<vmem>>, %arg5: memref<1x128xf32, #tpu.memory_space<vmem>>, %arg6: memref<1x128xf32, #tpu.memory_space<vmem>>) attributes {dimension_semantics = [#tpu.dimension_semantics<arbitrary>], iteration_bounds = array<i64: 1>, scalar_prefetch = 0 : i64, scratch_operands = 0 : i64, tpu.core_type = #tpu.core_type<tc>, window_params = [{transform_indices = @transform_0, window_bounds = array<i64: 32, 12>}, {pipeline_mode = #tpu.pipeline_mode<synchronous>, transform_indices = @transform_1, window_bounds = array<i64: 12, 128>}, {pipeline_mode = #tpu.pipeline_mode<synchronous>, transform_indices = @transform_2, window_bounds = array<i64: 1, 128>}, {transform_indices = @transform_3, window_bounds = array<i64: 32, 128>}, {pipeline_mode = #tpu.pipeline_mode<synchronous>, transform_indices = @transform_4, window_bounds = array<i64: 1, 128>}, {pipeline_mode = #tpu.pipeline_mode<synchronous>, transform_indices = @transform_5, window_bounds = array<i64: 1, 128>}]} {
    %c0 = arith.constant 0 : index
    %c0_0 = arith.constant 0 : index
    %0 = vector.load %arg1[%c0, %c0_0] : memref<32x12xbf16, #tpu.memory_space<vmem>>, vector<32x12xbf16>
    %c0_1 = arith.constant 0 : index
    %c0_2 = arith.constant 0 : index
    %1 = vector.load %arg2[%c0_1, %c0_2] : memref<12x128xbf16, #tpu.memory_space<vmem>>, vector<12x128xbf16>
    %cst = arith.constant dense<0.000000e+00> : vector<32x128xf32>
    %2 = tpu.matmul %0, %1, %cst {dimension_numbers = #tpu.dot_dimension_numbers<[1], [0], [0], [1], [0, 0, 1, 1], [], []>} : vector<32x12xbf16>, vector<12x128xbf16>, vector<32x128xf32> -> vector<32x128xf32>
    %c0_3 = arith.constant 0 : index
    %c0_4 = arith.constant 0 : index
    %3 = vector.load %arg3[%c0_3, %c0_4] : memref<1x128xf32, #tpu.memory_space<vmem>>, vector<1x128xf32>
    %4 = vector.broadcast %3 : vector<1x128xf32> to vector<32x128xf32>
    %5 = arith.addf %2, %4 : vector<32x128xf32>
    %c0_5 = arith.constant 0 : index
    %c0_6 = arith.constant 0 : index
    %6 = vector.load %arg4[%c0_5, %c0_6] : memref<32x128xf32, #tpu.memory_space<vmem>>, vector<32x128xf32>
    tpu.vector_store %arg4[%c0_5, %c0_6], %5 {strides = array<i32>} : memref<32x128xf32, #tpu.memory_space<vmem>>, vector<32x128xf32>,
    %c32_i32 = arith.constant 32 : i32
    %7 = arith.muli %arg0, %c32_i32 : i32
    %8 = tpu.iota {dimensions = array<i32: 0>} : vector<32x1xi32>
    %9 = vector.broadcast %7 : i32 to vector<32x1xi32>
    %10 = arith.addi %9, %8 : vector<32x1xi32>
    %c32_i32_7 = arith.constant 32 : i32
    %11 = vector.broadcast %c32_i32_7 : i32 to vector<32x1xi32>
    %12 = arith.cmpi slt, %10, %11 : vector<32x1xi32>
    %cst_8 = arith.constant 0.000000e+00 : f32
    %13 = vector.shape_cast %12 : vector<32x1xi1> to vector<32x1xi1>
    %14 = vector.broadcast %13 : vector<32x1xi1> to vector<32x128xi1>
    %15 = vector.broadcast %cst_8 : f32 to vector<32x128xf32>
    %16 = arith.select %14, %5, %15 : vector<32x128xi1>, vector<32x128xf32>
    %cst_9 = arith.constant dense<0.000000e+00> : vector<128xf32>
    %17 = vector.multi_reduction <add>, %16, %cst_9 [0] : vector<32x128xf32> to vector<128xf32>
    %18 = vector.shape_cast %17 : vector<128xf32> to vector<1x128xf32>
    %19 = arith.mulf %16, %16 : vector<32x128xf32>
    %cst_10 = arith.constant dense<0.000000e+00> : vector<128xf32>
    %20 = vector.multi_reduction <add>, %19, %cst_10 [0] : vector<32x128xf32> to vector<128xf32>
    %21 = vector.shape_cast %20 : vector<128xf32> to vector<1x128xf32>
    %c0_i32 = arith.constant 0 : i32
    %22 = arith.cmpi eq, %arg0, %c0_i32 : i32
    %23 = arith.extui %22 : i1 to i32
    %c0_i32_11 = arith.constant 0 : i32
    %24 = arith.cmpi ne, %23, %c0_i32_11 : i32
    scf.if %24 {
      %cst_20 = arith.constant 0.000000e+00 : f32
      %31 = vector.broadcast %cst_20 : f32 to vector<1x128xf32>
      %c0_21 = arith.constant 0 : index
      %c0_22 = arith.constant 0 : index
      %32 = vector.load %arg5[%c0_21, %c0_22] : memref<1x128xf32, #tpu.memory_space<vmem>>, vector<1x128xf32>
      tpu.vector_store %arg5[%c0_21, %c0_22], %31 {strides = array<i32>} : memref<1x128xf32, #tpu.memory_space<vmem>>, vector<1x128xf32>,
      %cst_23 = arith.constant 0.000000e+00 : f32
      %33 = vector.broadcast %cst_23 : f32 to vector<1x128xf32>
      %c0_24 = arith.constant 0 : index
      %c0_25 = arith.constant 0 : index
      %34 = vector.load %arg6[%c0_24, %c0_25] : memref<1x128xf32, #tpu.memory_space<vmem>>, vector<1x128xf32>
      tpu.vector_store %arg6[%c0_24, %c0_25], %33 {strides = array<i32>} : memref<1x128xf32, #tpu.memory_space<vmem>>, vector<1x128xf32>,
    } else {
    }
    %c0_12 = arith.constant 0 : index
    %c0_13 = arith.constant 0 : index
    %25 = vector.load %arg5[%c0_12, %c0_13] : memref<1x128xf32, #tpu.memory_space<vmem>>, vector<1x128xf32>
    %26 = arith.addf %25, %18 : vector<1x128xf32>
    %c0_14 = arith.constant 0 : index
    %c0_15 = arith.constant 0 : index
    %27 = vector.load %arg5[%c0_14, %c0_15] : memref<1x128xf32, #tpu.memory_space<vmem>>, vector<1x128xf32>
    tpu.vector_store %arg5[%c0_14, %c0_15], %26 {strides = array<i32>} : memref<1x128xf32, #tpu.memory_space<vmem>>, vector<1x128xf32>,
    %c0_16 = arith.constant 0 : index
    %c0_17 = arith.constant 0 : index
    %28 = vector.load %arg6[%c0_16, %c0_17] : memref<1x128xf32, #tpu.memory_space<vmem>>, vector<1x128xf32>
    %29 = arith.addf %28, %21 : vector<1x128xf32>
    %c0_18 = arith.constant 0 : index
    %c0_19 = arith.constant 0 : index
    %30 = vector.load %arg6[%c0_18, %c0_19] : memref<1x128xf32, #tpu.memory_space<vmem>>, vector<1x128xf32>
    tpu.vector_store %arg6[%c0_18, %c0_19], %29 {strides = array<i32>} : memref<1x128xf32, #tpu.memory_space<vmem>>, vector<1x128xf32>,
    return
  }
  func.func @transform_0(%arg0: i32) -> (i32, i32) {
    %c0_i32 = arith.constant 0 : i32
    %c0_i32_0 = arith.constant 0 : i32
    return %arg0, %c0_i32 : i32, i32
  }
  func.func @transform_1(%arg0: i32) -> (i32, i32) {
    %c0_i32 = arith.constant 0 : i32
    %c0_i32_0 = arith.constant 0 : i32
    %c0_i32_1 = arith.constant 0 : i32
    return %c0_i32, %c0_i32_0 : i32, i32
  }
  func.func @transform_2(%arg0: i32) -> (i32, i32) {
    %c0_i32 = arith.constant 0 : i32
    %c0_i32_0 = arith.constant 0 : i32
    %c0_i32_1 = arith.constant 0 : i32
    return %c0_i32, %c0_i32_0 : i32, i32
  }
  func.func @transform_3(%arg0: i32) -> (i32, i32) {
    %c0_i32 = arith.constant 0 : i32
    %c0_i32_0 = arith.constant 0 : i32
    return %arg0, %c0_i32 : i32, i32
  }
  func.func @transform_4(%arg0: i32) -> (i32, i32) {
    %c0_i32 = arith.constant 0 : i32
    %c0_i32_0 = arith.constant 0 : i32
    %c0_i32_1 = arith.constant 0 : i32
    return %c0_i32, %c0_i32_0 : i32, i32
  }
  func.func @transform_5(%arg0: i32) -> (i32, i32) {
    %c0_i32 = arith.constant 0 : i32
    %c0_i32_0 = arith.constant 0 : i32
    %c0_i32_1 = arith.constant 0 : i32
    return %c0_i32, %c0_i32_0 : i32, i32
  }
}

</mosaic_0001>

<bundles_post_ra>
// kernel: tpu_custom_call.1
= control target key start
LH: loop header
LB: loop body
LE: loop exit
PB: predicated region body
PF: predicated region fallthrough
CT: control target
= control target key end

     0   :  { %11 = vsyncpa [#allocation3], 0  ;;  %vm55_vm0 = vcmask 1045504   ;;  %vm48_vm1 = vcmask 97280   ;;  %s403_s0 = inlined_call_operand.vmem [shape: bf16[32,12], index: 0, kind: input, shape index: {}]   ;;  %s404_s1 = inlined_call_operand.vmem [shape: bf16[12,128], index: 1, kind: input, shape index: {}]   ;;  %s405_s2 = inlined_call_operand.vmem [shape: f32[1,128], index: 2, kind: input, shape index: {}]   ;;  %s406_s3 = inlined_call_operand.hbm [shape: f32[32,128], index: 3, kind: output, shape index: {0}]   ;;  %s407_s4 = inlined_call_operand.hbm [shape: f32[1,128], index: 4, kind: output, shape index: {1}]   ;;  %s408_s5 = inlined_call_operand.hbm [shape: f32[1,128], index: 5, kind: output, shape index: {2}]  }
   0x1   :  { %v238_v0 = vld [vmem:[%s404_s1] sm:$0x3f]   ;;  %v240_v3 = vld [vmem:[%s403_s0 + $0x8] sm:$0xff]  }
   0x2   :  { %v239_v1 = vld [vmem:[%s403_s0] sm:$0xff]   ;;  %231 = vmatprep.subr.msk.bf16.mxu0 %vm55_vm0, %v238_v0  ;;  %v57_v2 = vsel %vm55_vm0, %v238_v0, 0 }
   0x3   :  { %226 = vmatpush3.bf16.msra.mxu0 %v57_v2  ;;  %227 = vmatprep.mubr.msk.bf16.mxu0 %vm48_vm1, %v239_v1 }
   0x4   :  { %12 = vsyncpa [#allocation5], 0  ;;  %v311_v4 = vmov 0.0   ;;  %v216_v5 = vld [vmem:[%s405_s2] ss:$0 sm:$0xff]  ;;  %s312_s25 = smov [#allocation2]  }
   0x5   :  { %165 = vst [vmem:[#allocation4] sm:$0x1] %v311_v4  ;;  %166 = vst [vmem:[#allocation6] sm:$0x1] %v311_v4  ;;  %s178_s26 = sshll.u32 %s312_s25, 4  ;;  %s179_s26 = int_to_ptr.vmem [resolvable:$true] %s178_s26 }
   0x6   :  { %228 = vmatmul.mubr.msk.bf16.vlgmr.msra.gmra.mrb[0].mxu0 %vm48_vm1, %v240_v3  ;;  %s241_s0 = scalar_lea.vmem %s179_s26, 512  ;;  %p246_p1 = scmp.lt.s32.totalorder %s179_s26, %s179_s26 }
   0x7   :  { %p242_p0 = scmp.ne.s32.totalorder %s179_s26, %s241_s0  ;;  %p247_p2 = scmp.lt.s32.totalorder %s241_s0, %s241_s0 }
   0x9   :  { %p248_p3 = por %p247_p2, %p246_p1 }
   0xb   :  { %p249_p4 = pnand %p248_p3, %p242_p0 }
  0xd9   :  { %v229_v6 = vpop.f32.mrb[0].mxu0 }
  0xda   :  { %v102_v7 = vadd.f32 %v229_v6, %v216_v5  ;;  %v93_v8 = vpop.f32.mrb[1].mxu0 }
  0xdb   :  { %v94_v9 = vadd.f32 %v216_v5, %v93_v8  ;;  %v230_v10 = vpop.f32.mrb[2].mxu0 }
  0xdc   :  { %110 = vst [vmem:[#allocation2 + $0x10] sm:$0xff] %v102_v7  ;;  %v105_v11 = vadd.f32 %v230_v10, %v216_v5  ;;  %v96_v12 = vpop.f32.mrb[3].mxu0 }
  0xdd   :  { %108 = vst [vmem:[#allocation2] sm:$0xff] %v94_v9  ;;  %v97_v13 = vadd.f32 %v216_v5, %v96_v12  ;;  %v148_v14 = vmul.f32 %v94_v9, %v94_v9 }
  0xde   :  { %111 = vst [vmem:[#allocation2 + $0x18] sm:$0xff] %v105_v11 }
  0xdf   :  { %109 = vst [vmem:[#allocation2 + $0x8] sm:$0xff] %v97_v13  ;;  %v139_v15 = vadd.f32 %v97_v13, %v94_v9  ;;  %v149_v16 = vmul.f32 %v97_v13, %v97_v13 }
  0xe0   :  { %252 = shalt.err (!%p249_p4)
}
  0xe1   :  { %s253_s28 = scalar_lea.hbm %s406_s3, 512 }
  0xe2   :  { %p254_p5 = scmp.ne.s32.totalorder %s406_s3, %s253_s28  ;;  %p257_p6 = scmp.lt.u32.totalorder %s253_s28, %s406_s3 }
  0xe4   :  { %p259_p7 = pnand %p257_p6, %p254_p5 }
  0xe6   :  { %262 = shalt.err (!%p259_p7)
}
  0xe7   :  { %s313_s8 = smov 128   ;;  %s314_s9 = smov 8   ;;  %v150_v17 = vmul.f32 %v102_v7, %v102_v7  ;;  %v140_v18 = vadd.f32 %v139_v15, %v102_v7  ;;  %v152_v19 = vadd.f32 %v149_v16, %v148_v14  ;;  %v151_v20 = vmul.f32 %v105_v11, %v105_v11  ;;  %v167_v33 = vld [vmem:[#allocation4] sm:$0x1]  ;;  %v170_v36 = vld [vmem:[#allocation6] sm:$0x1] }
  0xe8   :  { %184 = dma.vmem_to_hbm [thread:$0]  %s179_s26, 512, %s406_s3, [#allocation3], %s313_s8, %s313_s8, %s314_s9  }
  0xe9   :  { %v141_v21 = vadd.f32 %v140_v18, %v105_v11  ;;  %v153_v22 = vadd.f32 %v152_v19, %v150_v17  ;;  %s315_s12 = smov [#allocation4]   ;;  %s316_s3 = smov [#allocation6]  }
  0xea   :  { %s191_s13 = sshll.u32 %s315_s12, 4  ;;  %s201_s14 = sshll.u32 %s316_s3, 4  ;;  %s192_s13 = int_to_ptr.vmem [resolvable:$true] %s191_s13  ;;  %s371_s14 = int_to_ptr.vmem [resolvable:$true] %s201_s14 }
  0xeb   :  { %v142_v23 = vrot.slane %v141_v21, 4  ;;  %v154_v24 = vadd.f32 %v153_v22, %v151_v20  ;;  %s263_s15 = scalar_lea.vmem %s192_s13, 16  ;;  %s267_s16 = scalar_lea.vmem %s192_s13, 32 }
  0xec   :  { %p264_p8 = scmp.ne.s32.totalorder %s192_s13, %s263_s15  ;;  %p268_p9 = scmp.lt.s32.totalorder %s192_s13, %s192_s13 }
  0xed   :  { %v143_v25 = vadd.f32 %v142_v23, %v141_v21  ;;  %v155_v26 = vrot.slane %v154_v24, 4  ;;  %p269_p10 = scmp.lt.s32.totalorder %s267_s16, %s263_s15 }
  0xef   :  { %v144_v27 = vrot.slane %v143_v25, 2  ;;  %v156_v28 = vadd.f32 %v155_v26, %v154_v24  ;;  %p270_p11 = por %p269_p10, %p268_p9 }
  0xf1   :  { %v145_v29 = vadd.f32 %v144_v27, %v143_v25  ;;  %v157_v30 = vrot.slane %v156_v28, 2  ;;  %p271_p12 = pnand %p270_p11, %p264_p8 }
  0xf3   :  { %v146_v31 = vrot.slane %v145_v29, 1  ;;  %v158_v32 = vadd.f32 %v157_v30, %v156_v28 }
  0xf5   :  { %v147_v34 = vadd.f32 %v146_v31, %v145_v29  ;;  %v159_v35 = vrot.slane %v158_v32, 1 }
  0xf7   :  { %v168_v37 = vadd.f32 %v167_v33, %v147_v34  ;;  %v160_v38 = vadd.f32 %v159_v35, %v158_v32 }
  0xf9   :  { %169 = vst [vmem:[#allocation4] sm:$0x1] %v168_v37  ;;  %v171_v39 = vadd.f32 %v170_v36, %v160_v38 }
  0xfa   :  { %274 = shalt.err (!%p271_p12)
}
  0xfb   :  { %s275_s19 = scalar_lea.hbm %s407_s4, 16 }
  0xfc   :  { %p276_p13 = scmp.ne.s32.totalorder %s407_s4, %s275_s19  ;;  %p279_p0 = scmp.lt.u32.totalorder %s275_s19, %s407_s4 }
  0xfe   :  { %p281_p1 = pnand %p279_p0, %p276_p13 }
 0x100   :  { %284 = shalt.err (!%p281_p1)
}
 0x101   :  { %194 = dma.vmem_to_hbm [thread:$0]  %s192_s13, 16, %s407_s4, [#allocation5]   ;;  %172 = vst [vmem:[#allocation6] sm:$0x1] %v171_v39 }
 0x102   :  { %s285_s25 = scalar_lea.vmem %s371_s14, 16  ;;  %s289_s26 = scalar_lea.vmem %s371_s14, 32 }
 0x103   :  { %p286_p2 = scmp.ne.s32.totalorder %s371_s14, %s285_s25  ;;  %p290_p3 = scmp.lt.s32.totalorder %s371_s14, %s371_s14 }
 0x104   :  { %p291_p4 = scmp.lt.s32.totalorder %s289_s26, %s285_s25 }
 0x106   :  { %p292_p5 = por %p291_p4, %p290_p3 }
 0x108   :  { %p293_p6 = pnand %p292_p5, %p286_p2 }
 0x10a   :  { %296 = shalt.err (!%p293_p6)
}
 0x10b   :  { %s297_s27 = scalar_lea.hbm %s408_s5, 16 }
 0x10c   :  { %p298_p7 = scmp.ne.s32.totalorder %s408_s5, %s297_s27  ;;  %p301_p8 = scmp.lt.u32.totalorder %s297_s27, %s408_s5 }
 0x10e   :  { %p303_p9 = pnand %p301_p8, %p298_p7 }
 0x110   :  { %306 = shalt.err (!%p303_p9)
}
 0x111   :  { %204 = dma.vmem_to_hbm [thread:$0]  %s371_s14, 16, %s408_s5, [#allocation5]  }
 0x112   :  { %307 = dma.done.wait [#allocation3], 512  }
 0x113   :  { %308 = vsyncadd [#allocation3], 4294966784 }
 0x114   :  { %309 = dma.done.wait [#allocation5], 32  }
 0x115   :  { %310 = vsyncadd [#allocation5], 4294967264 }
 0x116   :  { %214 = vsyncpa [#allocation3], 1 }
 0x117   :  { %215 = vsyncpa [#allocation5], 1 }

</bundles_post_ra>
